<compile_context>
chip_gen: v5e
topology: v5e:2x2
jax: 0.10.0
libtpu: 0.0.40
codegen_flags: <defaults>
</compile_context>

<pallas_src>
import jax
import jax.numpy as jnp
from jax.experimental import pallas as pl
from jax.experimental.pallas import tpu as pltpu


_MIN_STEPS = 4        # target minimum number of grid steps (pipelining / megacore)
_MIN_TD_SPLIT = 512   # don't shrink lane tiles below this when splitting for steps


def _cdiv(a, b):
    return -(-a // b)


def _round_up(v, m):
    return -(-v // m) * m


def _budget():
    """Per-TPU-generation tile / VMEM budget (safe fallback off-TPU)."""
    kind = ""
    try:
        kind = (getattr(jax.devices()[0], "device_kind", "") or "").lower()
    except Exception:
        pass
    if "v5" in kind or "v6" in kind:
        # 128 MiB VMEM generations: 8 MiB f32 stream tiles, generous limit.
        return 256, 8192, 100 << 20
    # v7x (64 MiB VMEM per TC) and unknown backends: conservative 4 MiB tiles.
    return 256, 4096, 48 << 20


def _pick_tiles(n, d, tm_max, td_max):
    # Rows: full extent if it fits, else fixed tm_max-row tiles with a masked
    # tail block (no host-side row padding).
    tm = n if n <= tm_max else tm_max
    n_tiles = _cdiv(n, tm)

    # Lanes: full extent if it fits the budget, else td_max-lane tiles
    # (multiple of 128) with a masked tail block (no host-side column padding).
    td = d if d <= td_max else td_max

    # Ensure >= _MIN_STEPS total grid steps when D can afford it, so DMA-in /
    # compute / DMA-out overlap and v7x shards the grid across both TCs.
    max_cols = max(1, d // _MIN_TD_SPLIT)
    want_cols = min(_cdiv(_MIN_STEPS, n_tiles), max_cols)
    if want_cols > 1:
        td = min(td, _round_up(_cdiv(d, want_cols), 128))
    return tm, td


def _diffuse_kernel(sa_ref, sc_ref, x_ref, eps_ref, out_ref):
    # sa_ref / sc_ref: VMEM (TM, 1) per-row sqrt(alpha_hat) / sqrt(1-alpha_hat)
    # x_ref / eps_ref / out_ref: VMEM (TM, TD) lane-dense tiles
    a = sa_ref[...]                               # (TM, 1) broadcasts over lanes
    c = sc_ref[...]
    out_ref[...] = (a * x_ref[...] + c * eps_ref[...]).astype(out_ref.dtype)


@jax.jit
def _diffuse_pallas(sqrt_ah, sqrt_omah, x_flat, eps_flat):
    n, d = x_flat.shape
    tm_max, td_max, vmem_limit = _budget()
    tm, td = _pick_tiles(n, d, tm_max, td_max)
    grid = (_cdiv(n, tm), _cdiv(d, td))

    # Memory-bound elementwise op: read x, read eps, write out (~12 B/elem f32).
    cost = pl.CostEstimate(
        flops=3 * n * d,
        transcendentals=0,
        bytes_accessed=3 * n * d * x_flat.dtype.itemsize,
    )

    return pl.pallas_call(
        _diffuse_kernel,
        out_shape=jax.ShapeDtypeStruct((n, d), x_flat.dtype),
        grid=grid,
        in_specs=[
            pl.BlockSpec((tm, 1), lambda i, j: (i, 0)),    # sqrt(alpha_hat)
            pl.BlockSpec((tm, 1), lambda i, j: (i, 0)),    # sqrt(1 - alpha_hat)
            pl.BlockSpec((tm, td), lambda i, j: (i, j)),   # x
            pl.BlockSpec((tm, td), lambda i, j: (i, j)),   # eps
        ],
        out_specs=pl.BlockSpec((tm, td), lambda i, j: (i, j)),
        compiler_params=pltpu.CompilerParams(
            dimension_semantics=("parallel", "parallel"),
            vmem_limit_bytes=vmem_limit,
        ),
        cost_estimate=cost,
    )(sqrt_ah, sqrt_omah, x_flat, eps_flat)


class DiffusionPallas:
    """JAX/Pallas port of the PyTorch Diffusion module's forward pass."""

    def __init__(self, image_size=(32, 32), num_steps=1000,
                 beta_start=1e-4, beta_end=0.02):
        self.width, self.height = image_size
        self.num_steps = num_steps
        # Linear (non-cosine) schedule, exactly as in __init__:
        self.beta = jnp.linspace(beta_start, beta_end, num_steps, dtype=jnp.float32)
        self.alpha = 1.0 - self.beta
        self.alpha_hat = jnp.cumprod(self.alpha, axis=0)

    def forward(self, x, t, key):
        """x: (N, C, H, W) float32; t: (N,) int32 timesteps; key: PRNG key."""
        n, c, h, w = x.shape
        d = c * h * w
        # Glue (gather + sqrt) in plain JAX; hot elementwise path in Pallas.
        alpha_hat_t = jnp.take(self.alpha_hat, t)                         # (N,)
        sqrt_ah = jnp.sqrt(alpha_hat_t).astype(jnp.float32)[:, None]      # (N,1)
        sqrt_omah = jnp.sqrt(1.0 - alpha_hat_t).astype(jnp.float32)[:, None]
        # randn_like(x) equivalent, generated in plain JAX (portable lowering).
        eps = jax.random.normal(key, x.shape, dtype=x.dtype)
        out_flat = _diffuse_pallas(sqrt_ah, sqrt_omah,
                                   x.reshape(n, d), eps.reshape(n, d))
        return out_flat.reshape(n, c, h, w), eps


if __name__ == "__main__":
    # Small shapes consistent with the module: batch=2, channels=4, spatial=16.
    N, C, H, W = 2, 4, 16, 16
    num_steps = 1000

    key = jax.random.PRNGKey(0)
    kx, kt, keps = jax.random.split(key, 3)

    x = jax.random.normal(kx, (N, C, H, W), dtype=jnp.float32)
    t = jax.random.randint(kt, (N,), 0, num_steps, dtype=jnp.int32)

    diff = DiffusionPallas(image_size=(W, H), num_steps=num_steps)
    noised, eps = diff.forward(x, t, keps)
    noised = jax.block_until_ready(noised)
    eps = jax.block_until_ready(eps)

    assert noised.shape == (N, C, H, W) and eps.shape == (N, C, H, W)

    # Reference: sqrt(ah)*x + sqrt(1-ah)*eps with the exact eps that was used.
    ah = jnp.take(diff.alpha_hat, t)[:, None, None, None]
    ref = jnp.sqrt(ah) * x + jnp.sqrt(1.0 - ah) * eps
    assert jnp.allclose(noised, ref, atol=1e-5, rtol=1e-5)

    # Sanity: eps is standard-normal-ish (2048 samples) and finite.
    assert bool(jnp.all(jnp.isfinite(eps)))
    assert float(jnp.abs(jnp.mean(eps))) < 0.2
    assert 0.7 < float(jnp.std(eps)) < 1.3

    print("KERNEL_OK")
</pallas_src>

<mosaic_0001>
module attributes {stable_mosaic.version = 11 : i64} {
  func.func @_diffuse_kernel(%arg0: i32, %arg1: i32, %arg2: memref<2x1xf32, #tpu.memory_space<vmem>>, %arg3: memref<2x1xf32, #tpu.memory_space<vmem>>, %arg4: memref<2x512xf32, #tpu.memory_space<vmem>>, %arg5: memref<2x512xf32, #tpu.memory_space<vmem>>, %arg6: memref<2x512xf32, #tpu.memory_space<vmem>>) attributes {dimension_semantics = [#tpu.dimension_semantics<parallel>, #tpu.dimension_semantics<parallel>], iteration_bounds = array<i64: 1, 2>, scalar_prefetch = 0 : i64, scratch_operands = 0 : i64, tpu.core_type = #tpu.core_type<tc>, window_params = [{transform_indices = @transform_0, window_bounds = array<i64: 2, 1>}, {transform_indices = @transform_1, window_bounds = array<i64: 2, 1>}, {transform_indices = @transform_2, window_bounds = array<i64: 2, 512>}, {transform_indices = @transform_3, window_bounds = array<i64: 2, 512>}, {transform_indices = @transform_4, window_bounds = array<i64: 2, 512>}]} {
    %c0 = arith.constant 0 : index
    %c0_0 = arith.constant 0 : index
    %0 = vector.load %arg2[%c0, %c0_0] : memref<2x1xf32, #tpu.memory_space<vmem>>, vector<2x1xf32>
    %c0_1 = arith.constant 0 : index
    %c0_2 = arith.constant 0 : index
    %1 = vector.load %arg3[%c0_1, %c0_2] : memref<2x1xf32, #tpu.memory_space<vmem>>, vector<2x1xf32>
    %c0_3 = arith.constant 0 : index
    %c0_4 = arith.constant 0 : index
    %2 = vector.load %arg4[%c0_3, %c0_4] : memref<2x512xf32, #tpu.memory_space<vmem>>, vector<2x512xf32>
    %3 = vector.broadcast %0 : vector<2x1xf32> to vector<2x512xf32>
    %4 = arith.mulf %3, %2 : vector<2x512xf32>
    %c0_5 = arith.constant 0 : index
    %c0_6 = arith.constant 0 : index
    %5 = vector.load %arg5[%c0_5, %c0_6] : memref<2x512xf32, #tpu.memory_space<vmem>>, vector<2x512xf32>
    %6 = vector.broadcast %1 : vector<2x1xf32> to vector<2x512xf32>
    %7 = arith.mulf %6, %5 : vector<2x512xf32>
    %8 = arith.addf %4, %7 : vector<2x512xf32>
    %c0_7 = arith.constant 0 : index
    %c0_8 = arith.constant 0 : index
    %9 = vector.load %arg6[%c0_7, %c0_8] : memref<2x512xf32, #tpu.memory_space<vmem>>, vector<2x512xf32>
    tpu.vector_store %arg6[%c0_7, %c0_8], %8 {strides = array<i32>} : memref<2x512xf32, #tpu.memory_space<vmem>>, vector<2x512xf32>,
    return
  }
  func.func @transform_0(%arg0: i32, %arg1: i32) -> (i32, i32) {
    %c0_i32 = arith.constant 0 : i32
    %c0_i32_0 = arith.constant 0 : i32
    return %arg0, %c0_i32 : i32, i32
  }
  func.func @transform_1(%arg0: i32, %arg1: i32) -> (i32, i32) {
    %c0_i32 = arith.constant 0 : i32
    %c0_i32_0 = arith.constant 0 : i32
    return %arg0, %c0_i32 : i32, i32
  }
  func.func @transform_2(%arg0: i32, %arg1: i32) -> (i32, i32) {
    %c0_i32 = arith.constant 0 : i32
    return %arg0, %arg1 : i32, i32
  }
  func.func @transform_3(%arg0: i32, %arg1: i32) -> (i32, i32) {
    %c0_i32 = arith.constant 0 : i32
    return %arg0, %arg1 : i32, i32
  }
  func.func @transform_4(%arg0: i32, %arg1: i32) -> (i32, i32) {
    %c0_i32 = arith.constant 0 : i32
    return %arg0, %arg1 : i32, i32
  }
}

</mosaic_0001>

<bundles_post_ra>
// kernel: _diffuse_pallas.1
= control target key start
LH: loop header
LB: loop body
LE: loop exit
PB: predicated region body
PF: predicated region fallthrough
CT: control target
= control target key end

     0   :  { %9 = vsyncpa [#allocation3], 0  ;;  %s941_s0 = inlined_call_operand.vmem [shape: f32[2,1], index: 0, kind: input, shape index: {}]   ;;  %s942_s1 = inlined_call_operand.vmem [shape: f32[2,1], index: 1, kind: input, shape index: {}]   ;;  %s943_s2 = inlined_call_operand.hbm [shape: f32[2,1024], index: 2, kind: input, shape index: {}]   ;;  %s944_s3 = inlined_call_operand.hbm [shape: f32[2,1024], index: 3, kind: input, shape index: {}]   ;;  %s945_s4 = inlined_call_operand.hbm [shape: f32[2,1024], index: 4, kind: output, shape index: {}]  }
   0x1   :  { %11 = vsyncpa [#allocation3 + $0x1], 0 }
   0x2   :  { %12 = vsyncpa [#allocation6], 0 }
   0x3   :  { %14 = vsyncpa [#allocation6 + $0x1], 0 }
   0x4   :  { %15 = vsyncpa [#allocation4], 0 }
   0x5   :  { %17 = vsyncpa [#allocation4 + $0x1], 0  ;;  %s802_s15 = smov 0   ;;  %s804_s16 = smov 0  }
   0x6   :  { %s806_s17 = smov 0   ;;  %s808_s18 = smov 0  }
   0x7   :  { %s810_s19 = smov 0   ;;  %s812_s20 = smov 0  }
   0x8 LB: > { %s535_s21 = sadd.s32 4294967295, %s774_s20   ;;  %s536_s22 = sadd.s32 4294967294, %s774_s20   ;;  %s774_s20 = sphi %s812_s20, %s23_s20   ;;  %s770_s19 = sphi %s810_s19, %s957_s19   ;;  %s766_s18 = sphi %s808_s18, %s956_s18   ;;  %s762_s17 = sphi %s806_s17, %s955_s17   ;;  %s758_s16 = sphi %s804_s16, %s954_s16   ;;  %s754_s15 = sphi %s802_s15, %s953_s15  }
   0x9   : > { %s32_s23 = sadd.s32 1, %s770_s19  ;;  %s96_s24 = sadd.s32 1, %s762_s17 }
   0xa   : > { %p33_p0 = scmp.ge.s32.totalorder %s32_s23, 2  ;;  %p103_p1 = scmp.ne.s32.totalorder %s762_s17, %s758_s16 }
   0xb   : > { %p104_p2 = scmp.eq.s32.totalorder %s774_s20, 0  ;;  %p109_p3 = scmp.ne.s32.totalorder %s758_s16, %s754_s15 }
   0xc   : > { %s959_s23 = smov (%p33_p0, %s32_s23), 0  ;;  %p110_p5 = scmp.eq.s32.totalorder %s535_s21, 0 }
   0xd   : > { %947 = sst [smem:[#allocation11_spill]] %s959_s23  ;;  %p843_p4 = por %p104_p2, %p103_p1 }
   0xe   : > { %s92_s26 = ssub.s32 %s770_s19, %s959_s23  ;;  %p163_p6 = scmp.eq.s32.totalorder %s535_s21, 1 }
   0xf   : > { %p94_p7 = scmp.eq.s32.totalorder %s92_s26, 0  ;;  %p849_p8 = por %p110_p5, %p109_p3 }
  0x10   : > { %p853_p9 = por %p163_p6, %p103_p1  ;;  %p169_p10 = scmp.eq.s32.totalorder %s536_s22, 1 }
  0x11   : > { %s858_s29 = scalar_select %p94_p7, %s762_s17, %s96_s24  }
  0x12   : > { %p860_p11 = por %p169_p10, %p109_p3  ;;  %p540_p12 = scmp.ge.s32.totalorder %s774_s20, 2 }
  0x13   : > { %p576_p13 = scmp.lt.s32.totalorder %s774_s20, 2  ;;  %s203_s5 = sand.u32 1, %s762_s17  }
  0x14   : > { %s541_s6 = sshll.u32 %s203_s5, 3  ;;  %s556_s7 = sshll.u32 %s770_s19, 3 }
  0x15   : > { %s214_s10 = scalar_lea.hbm %s943_s2, %s556_s7  ;;  %s207_s11 = scalar_lea.vmem [#allocation2], %s541_s6 }
  0x16   : > { %s218_s12 = sshll.u32 %s207_s11, 4  ;;  %s216_s13 = sshll.u32 %s214_s10, 4  ;;  %s219_s12 = int_to_ptr.vmem [resolvable:$true] %s218_s12  ;;  %s217_s13 = int_to_ptr.hbm [resolvable:$true] %s216_s13 }
  0x17   : > { %p566_p0 = pnand %p576_p13, %p843_p4  ;;  %p547_p1 = scmp.ge.s32.totalorder %s774_s20, 1 }
  0x18   : > { %p245_p2 = scmp.lt.s32.totalorder %s774_s20, 3  ;;  %s204_s14 = scalar_lea.sflag [#allocation3], %s203_s5 }
  0x19   : > { %568 = dma.hbm_to_vmem [thread:$0]  (!%p566_p0), %s217_s13, 128, %s219_s12, %s204_s14  }
  0x1a   : > { %p246_p3 = pnand %p547_p1, %p245_p2  ;;  %s236_s24 = scalar_lea.hbm %s944_s3, %s556_s7 }
  0x1b   : > { %s229_s26 = scalar_lea.vmem [#allocation5], %s541_s6  ;;  %s238_s8 = sshll.u32 %s236_s24, 4  ;;  %s239_s8 = int_to_ptr.hbm [resolvable:$true] %s238_s8 }
  0x1c   : > { %s240_s23 = sshll.u32 %s229_s26, 4  ;;  %s226_s9 = scalar_lea.sflag [#allocation6], %s203_s5  ;;  %s241_s23 = int_to_ptr.vmem [resolvable:$true] %s240_s23 }
  0x1d   : > { %571 = dma.hbm_to_vmem [thread:$0]  (!%p566_p0), %s239_s8, 128, %s241_s23, %s226_s9  }
  0x1e   : > { %249 = sbr.rel (%p246_p3) target bundleno = 174 (0xae), region = 36  ;;  %s879_s25 = sand.u32 (!%p246_p3), 1, %s758_s16  }
  0x1f   : > { %s882_s10 = sshll.u32 (!%p246_p3), %s879_s25, 3  ;;  %s252_s11 = scalar_lea.sflag (!%p246_p3), [#allocation3], %s879_s25 }
  0x20   : > { %s255_s12 = scalar_lea.vmem (!%p246_p3), [#allocation2], %s882_s10 }
  0x23   : > { %741 = dma.done.wait (%p849_p8), %s252_s11, 128  }
  0x24   : > { %743 = vsyncadd (%p849_p8), %s252_s11, 4294967168  ;;  %s262_s23 = scalar_lea.sflag [#allocation6], %s879_s25  ;;  %s265_s5 = scalar_lea.vmem [#allocation5], %s882_s10 }
  0x25   : > { %745 = dma.done.wait (%p849_p8), %s262_s23, 128  }
  0x26   : > { %747 = vsyncadd (%p849_p8), %s262_s23, 4294967168  ;;  %v776_v0 = vmov 0   ;;  %v315_v1 = vld [vmem:[%s941_s0] sm:$0x3]  ;;  %v317_v2 = vld [vmem:[%s255_s12] sm:$0xff]  ;;  %s558_s27 = sshll.u32 %s766_s18, 3 }
  0x27   : > { %627 = vset.pattern.permute.xlu0 %v776_v0  ;;  %324 = vst [vmem:[#allocation1] ss:$4 sm:$0xff] %v317_v2  ;;  %v316_v3 = vld [vmem:[%s942_s1] sm:$0x3]  ;;  %s390_s24 = scalar_lea.hbm %s945_s4, %s558_s27  ;;  %vm368_vm0 = vcmask 1041408   ;;  %vm370_vm1 = vcmask 1045508  }
  0x28   : > { %320 = vperm.xlu0 %627, %v315_v1   ;;  %v337_v4 = vld [vmem:[%s265_s5] sm:$0xff]  ;;  %vm372_vm2 = vcmask 1043456   ;;  %s303_s18 = scalar_lea.vmem [#allocation7], %s882_s10  ;;  %s394_s8 = sshll.u32 %s390_s24, 4  ;;  %s395_s8 = int_to_ptr.hbm [resolvable:$true] %s394_s8 }
  0x29   : > { %s392_s26 = sshll.u32 %s303_s18, 4  ;;  %s377_s9 = scalar_lea.sflag [#allocation4], %s879_s25  ;;  %s393_s26 = int_to_ptr.vmem [resolvable:$true] %s392_s26 }
  0x2a   : > { %s702_s11 = sshra.s32 %s395_s8, 4  ;;  %s708_s5 = scalar_lea.hbm %s945_s4, 16  ;;  %s703_s11 = int_to_ptr.hbm [resolvable:$true] %s702_s11 }
  0x2b   : > { %s704_s12 = scalar_lea.hbm %s703_s11, 8  ;;  %p709_p7 = scmp.lt.s32.totalorder %s703_s11, %s945_s4 }
  0x2c   : > { %p705_p4 = scmp.ne.s32.totalorder %s703_s11, %s704_s12  ;;  %p710_p8 = scmp.lt.s32.totalorder %s708_s5, %s704_s12 }
  0x2e   : > { %v325_v5 = vld.sshfl [vmem:[#allocation1] sm:$0xff pattern:$0x73625140]  ;;  %v326_v6 = vld.sshfl [vmem:[#allocation1 + $0x8] sm:$0xff pattern:$0x73625140]  ;;  %p706_p5 = pnand %p705_p4, %p853_p9  ;;  %p711_p10 = por %p710_p8, %p709_p7 }
  0x2f   : > { %v327_v7 = vld.sshfl [vmem:[#allocation1 + $0x10] sm:$0xff pattern:$0x73625140]  ;;  %v328_v8 = vld.sshfl [vmem:[#allocation1 + $0x18] sm:$0xff pattern:$0x73625140] }
  0x30   : > { %340 = vperm.xlu0 %627, %v316_v3   ;;  %344 = vst [vmem:[#allocation1] ss:$4 sm:$0xff] %v337_v4  ;;  %p707_p6 = pneg %p706_p5 }
  0x32   : > { %p712_p13 = pnand %p711_p10, %p707_p6 }
  0x37   : > { %v345_v10 = vld.sshfl [vmem:[#allocation1] sm:$0xff pattern:$0x73625140]  ;;  %v346_v11 = vld.sshfl [vmem:[#allocation1 + $0x8] sm:$0xff pattern:$0x73625140] }
  0x38   : > { %v347_v12 = vld.sshfl [vmem:[#allocation1 + $0x10] sm:$0xff pattern:$0x73625140]  ;;  %v348_v13 = vld.sshfl [vmem:[#allocation1 + $0x18] sm:$0xff pattern:$0x73625140] }
  0x9a   : > { %v321_v9 = vpop.permute.xlu0 %320 }
  0x9b   : > { %v334_v14 = vmul.f32 %v326_v6, %v321_v9  ;;  %v335_v15 = vmul.f32 %v327_v7, %v321_v9  ;;  %v336_v16 = vmul.f32 %v328_v8, %v321_v9  ;;  %v333_v22 = vmul.f32 %v325_v5, %v321_v9 }
  0xa2   : > { %v341_v17 = vpop.permute.xlu0 %340 }
  0xa3   : > { %v353_v18 = vmul.f32 %v345_v10, %v341_v17  ;;  %v354_v19 = vmul.f32 %v346_v11, %v341_v17  ;;  %v355_v20 = vmul.f32 %v347_v12, %v341_v17  ;;  %v356_v21 = vmul.f32 %v348_v13, %v341_v17 }
  0xa5   : > { %v358_v23 = vadd.f32 %v354_v19, %v334_v14  ;;  %v359_v24 = vadd.f32 %v355_v20, %v335_v15  ;;  %v360_v25 = vadd.f32 %v356_v21, %v336_v16  ;;  %v357_v26 = vadd.f32 %v353_v18, %v333_v22 }
  0xa7   : > { %v365_v27 = vrot.slane %v358_v23, 6  ;;  %v366_v28 = vrot.slane %v359_v24, 4  ;;  %v367_v29 = vrot.slane %v360_v25, 2 }
  0xa9   : > { %v369_v30 = vsel %vm368_vm0, %v357_v26, %v365_v27  ;;  %v371_v31 = vsel %vm370_vm1, %v366_v28, %v367_v29 }
  0xaa   : > { %v373_v32 = vsel %vm372_vm2, %v369_v30, %v371_v31 }
  0xab   : > { %375 = vst [vmem:[%s303_s18] sm:$0xff] %v373_v32 }
  0xac   : > { %715 = shalt.err (!%p712_p13)
}
  0xad   : > { %563 = dma.vmem_to_hbm [thread:$0]  (%p853_p9), %s393_s26, 128, %s395_s8, %s377_s9  }
  0xae PF: > { %s406_s25 = sand.u32 1, %s754_s15   ;;  %p573_p0 = pnand %p540_p12, %p860_p11 }
  0xaf   : > { %s407_s13 = scalar_lea.sflag [#allocation4], %s406_s25 }
  0xb0   : > { %p574_p1 = pneg %p573_p0 }
  0xb2   : > { %749 = dma.done.wait (%p574_p1), %s407_s13, 128  }
  0xb3   : > { %751 = vsyncadd (%p574_p1), %s407_s13, 4294967168  ;;  %s23_s20 = sadd.s32 1, %s774_s20   ;;  %s952_s28 = sld [smem:[#allocation11_spill]] }
  0xb4   : > { %p20_p2 = scmp.ge.s32.totalorder %s23_s20, 4   ;;  %s953_s15 = smov %s758_s16 }
  0xb5   : > { %s954_s16 = smov %s762_s17  ;;  %s955_s17 = smov %s858_s29 }
  0xb6   : > { %s956_s18 = smov %s770_s19  ;;  %22 = sbr.rel (!%p20_p2) target bundleno = 8 (0x8), region = 100 }
  0xb9   : > { %s957_s19 = smov %s952_s28 }
  0xbb   :  { %413 = vsyncpa [#allocation3], 1 }
  0xbc   :  { %415 = vsyncpa [#allocation3 + $0x1], 1 }
  0xbd   :  { %416 = vsyncpa [#allocation6], 1 }
  0xbe   :  { %418 = vsyncpa [#allocation6 + $0x1], 1 }
  0xbf   :  { %419 = vsyncpa [#allocation4], 1 }
  0xc0   :  { %421 = vsyncpa [#allocation4 + $0x1], 1 }

</bundles_post_ra>
